<compile_context>
chip_gen: v7x
topology: tpu7x:2x2x1
jax: 0.10.0
libtpu: 0.0.40
codegen_flags: <defaults>
</compile_context>

<pallas_src>
import jax
import jax.numpy as jnp
from jax import lax
from jax.experimental import pallas as pl
from jax.experimental.pallas import tpu as pltpu


_NEG_CAP = -1e30  # clamp for the running max so a fully-masked S_enc *block* can't NaN the row


def _round_up(x, m):
    return ((x + m - 1) // m) * m


def _tpu_generation():
    try:
        kind = jax.devices()[0].device_kind.lower()
    except Exception:
        return 0
    for g in (7, 6, 5, 4):
        if ("v%d" % g) in kind:
            return g
    return 0


def _vmem_capacity_bytes():
    try:
        cap = int(pltpu.get_tpu_info().vmem_capacity_bytes)
        if cap > 0:
            return cap
    except Exception:
        pass
    # Conservative fallback: v7x per-TensorCore VMEM (safe on every generation).
    return 64 << 20


# ---------------------------------------------------------------------------
# Fused kernel: query projection + masked online-softmax attention
# grid = (batch_blocks, enc_blocks)   dims = ("parallel", "arbitrary")
# ---------------------------------------------------------------------------
def _fused_attention_kernel(w_ref, hdec_ref, henc_ref, bias_ref, out_ref,
                            q_ref, m_ref, l_ref, acc_ref):
    k = pl.program_id(1)

    @pl.when(k == 0)
    def _():
        # Query projection for this batch block, once per block, stays in VMEM.
        #   q = h_t_dec @ W^T  (contract last axes of both -> no transpose copy).
        q = lax.dot_general(
            hdec_ref[...], w_ref[...],
            dimension_numbers=(((2,), (1,)), ((), ())),
            preferred_element_type=jnp.float32)
        q_ref[...] = q.astype(q_ref.dtype)
        m_ref[...] = jnp.full(m_ref.shape, -jnp.inf, dtype=m_ref.dtype)
        l_ref[...] = jnp.zeros(l_ref.shape, dtype=l_ref.dtype)
        acc_ref[...] = jnp.zeros(acc_ref.shape, dtype=acc_ref.dtype)

    h_enc = henc_ref[...]                           # (Bt, Sk, H)

    # scores[b, i, j] = sum_h q[b, i, h] * h_enc[b, j, h]   (batched, no transpose)
    s = lax.dot_general(
        q_ref[...], h_enc,
        dimension_numbers=(((2,), (2,)), ((0,), (0,))),
        preferred_element_type=jnp.float32)         # (Bt, S_dec, Sk) f32
    s = s + bias_ref[...]                           # additive mask bias (0 / -inf)

    # Online (flash-style) softmax across the S_enc grid axis.
    m_prev = m_ref[...]
    m_next = jnp.maximum(m_prev, jnp.max(s, axis=-1, keepdims=True))
    m_safe = jnp.maximum(m_next, _NEG_CAP)          # avoid (-inf)-(-inf) NaN on masked blocks
    alpha = jnp.exp(m_prev - m_safe)
    p = jnp.exp(s - m_safe)
    l_ref[...] = alpha * l_ref[...] + jnp.sum(p, axis=-1, keepdims=True)
    acc_ref[...] = alpha * acc_ref[...] + lax.dot_general(
        p.astype(h_enc.dtype), h_enc,
        dimension_numbers=(((2,), (1,)), ((0,), (0,))),
        preferred_element_type=jnp.float32)
    m_ref[...] = m_safe

    @pl.when(k == pl.num_programs(1) - 1)
    def _():
        denom = l_ref[...]
        r = pl.reciprocal(denom, approx=True)       # EUP
        r = r * (2.0 - denom * r)                   # one Newton step -> full f32 accuracy
        out_ref[...] = (acc_ref[...] * r).astype(out_ref.dtype)


def _pick_block_b(B, s_dec, h, block_k, in_isz, out_isz, mm_isz, budget, multi_core):
    """Batch elements per grid step: counts double-buffered input/output blocks,
    the VMEM scratch (q / m / l / acc) and the live f32 softmax intermediates."""
    def usage(bb):
        blocks = (2 * h * h * in_isz                  # weight (constant index; budgeted at 2x)
                  + 2 * bb * s_dec * h * in_isz       # h_t_dec block
                  + 2 * bb * block_k * h * in_isz     # h_enc block
                  + 2 * bb * block_k * 4              # bias block
                  + 2 * bb * s_dec * h * out_isz)     # output block
        scratch = bb * s_dec * h * (mm_isz + 4) + 2 * bb * s_dec * 4
        live = 3 * bb * s_dec * block_k * 4 + bb * s_dec * h * 4   # s, p, exp copies + ctx
        return blocks + scratch + live

    if multi_core and B >= 2:
        bb = (B + 1) // 2          # >= 2 grid steps so both v7x TensorCores get work
    else:
        bb = B                     # single TC (v5e/v6e): one big block amortizes step cost
    while bb > 1 and usage(bb) > budget:
        bb = (bb + 1) // 2
    return max(1, bb)


def attention(weight_lin, h_enc, h_t_dec, mask=None, *, matmul_dtype="auto", block_k_max=512):
    """Forward of seq2seq.Attention.

    weight_lin : (H, H)  nn.Linear weight (out_features, in_features), no bias
    h_enc      : (B, S_enc, H)
    h_t_dec    : (B, S_dec, H)
    mask       : optional (B, S_enc) or (B, 1, S_enc); True/1 == masked position
    matmul_dtype: "auto" (bf16 MXU inputs on v6e/v7x, f32 elsewhere), a dtype,
                  or None (use the input dtype). Softmax/accumulation stay f32.
    """
    B, S_enc, H = h_enc.shape
    Bd, S_dec, Hd = h_t_dec.shape
    assert Bd == B and Hd == H and weight_lin.shape == (H, H)
    out_dtype = h_t_dec.dtype

    gen = _tpu_generation()
    if matmul_dtype == "auto":
        mm_dtype = jnp.bfloat16 if gen >= 6 else jnp.float32
    elif matmul_dtype is None:
        mm_dtype = h_t_dec.dtype
    else:
        mm_dtype = matmul_dtype
    in_isz = jnp.dtype(mm_dtype).itemsize
    out_isz = jnp.dtype(out_dtype).itemsize

    # ---- mask -> additive f32 bias (0 / -inf), matches masked_fill_(-inf) -------
    # NOTE: fully-masked rows still produce NaN (softmax over all -inf), same as PyTorch.
    if mask is None:
        bias = jnp.zeros((B, 1, S_enc), jnp.float32)
    else:
        m = mask.reshape(B, 1, S_enc).astype(bool)
        bias = jnp.where(m, -jnp.inf, 0.0).astype(jnp.float32)

    # ---- pad to TPU-friendly (lane-dense) shapes ---------------------------------
    sub = 16 if in_isz == 2 else 8
    Hp = _round_up(H, 128)
    Sd = _round_up(S_dec, sub)
    block_k = min(_round_up(S_enc, 128), block_k_max)
    Se = _round_up(S_enc, block_k)

    # ---- VMEM budget & batch block size ------------------------------------------
    cap = _vmem_capacity_bytes()
    vmem_limit = max(32 << 20, min(cap - (12 << 20), 112 << 20))
    budget = int(vmem_limit * 0.8)
    multi_core = gen >= 7                      # v7x has 2 TensorCores per chip
    block_b = _pick_block_b(B, Sd, Hp, block_k, in_isz, out_isz, in_isz, budget, multi_core)
    Bp = _round_up(B, block_b)

    # ---- pad inputs (zeros; padded enc positions carry -inf bias) -----------------
    w_p = jnp.pad(weight_lin.astype(mm_dtype), ((0, Hp - H), (0, Hp - H)))
    hdec_p = jnp.pad(h_t_dec.astype(mm_dtype),
                     ((0, Bp - B), (0, Sd - S_dec), (0, Hp - H)))
    henc_p = jnp.pad(h_enc.astype(mm_dtype),
                     ((0, Bp - B), (0, Se - S_enc), (0, Hp - H)))
    bias_p = jnp.pad(bias, ((0, 0), (0, 0), (0, Se - S_enc)), constant_values=-jnp.inf)
    bias_p = jnp.pad(bias_p, ((0, Bp - B), (0, 0), (0, 0)))   # padded batch rows: 0-bias, finite

    grid = (Bp // block_b, Se // block_k)

    cost = pl.CostEstimate(
        flops=2 * Bp * Sd * Hp * Hp + 4 * Bp * Sd * Se * Hp,
        transcendentals=Bp * Sd * Se + Bp * Sd,
        bytes_accessed=(Hp * Hp * in_isz
                        + Bp * Sd * Hp * in_isz
                        + Bp * Se * Hp * in_isz
                        + Bp * Se * 4
                        + Bp * Sd * Hp * out_isz),
    )

    # TODO(synk): pin the weight block with pipeline_mode=pl.Buffered(1) (constant
    # index_map => single buffer suffices) once verified on the target toolchain.
    out = pl.pallas_call(
        _fused_attention_kernel,
        out_shape=jax.ShapeDtypeStruct((Bp, Sd, Hp), out_dtype),
        grid_spec=pltpu.PrefetchScalarGridSpec(
            num_scalar_prefetch=0,
            grid=grid,
            in_specs=[
                pl.BlockSpec((Hp, Hp), lambda b, k: (0, 0)),                    # W (VMEM resident)
                pl.BlockSpec((block_b, Sd, Hp), lambda b, k: (b, 0, 0)),        # h_t_dec block
                pl.BlockSpec((block_b, block_k, Hp), lambda b, k: (b, k, 0)),   # h_enc block
                pl.BlockSpec((block_b, 1, block_k), lambda b, k: (b, 0, k)),    # mask bias block
            ],
            out_specs=pl.BlockSpec((block_b, Sd, Hp), lambda b, k: (b, 0, 0)),
            scratch_shapes=[
                pltpu.VMEM((block_b, Sd, Hp), mm_dtype),     # q (projected query)
                pltpu.VMEM((block_b, Sd, 1), jnp.float32),   # running max
                pltpu.VMEM((block_b, Sd, 1), jnp.float32),   # running denominator
                pltpu.VMEM((block_b, Sd, Hp), jnp.float32),  # context accumulator
            ],
        ),
        compiler_params=pltpu.CompilerParams(
            dimension_semantics=("parallel", "arbitrary"),
            vmem_limit_bytes=vmem_limit,
        ),
        cost_estimate=cost,
    )(w_p, hdec_p, henc_p, bias_p)

    return out[:B, :S_dec, :H]


# ---------------------------------------------------------------------------
# Pure-JAX reference (mirrors the PyTorch module)
# ---------------------------------------------------------------------------
def attention_ref(weight_lin, h_enc, h_t_dec, mask=None):
    q = jnp.einsum('bqh,oh->bqo', h_t_dec, weight_lin)
    s = jnp.einsum('bqh,bkh->bqk', q, h_enc)
    if mask is not None:
        s = jnp.where(mask[:, None, :], -jnp.inf, s)
    p = jax.nn.softmax(s, axis=-1)
    return jnp.einsum('bqk,bkh->bqh', p, h_enc)


if __name__ == "__main__":
    B, S_enc, S_dec, H = 2, 8, 8, 32

    key = jax.random.PRNGKey(0)
    k_w, k_enc, k_dec = jax.random.split(key, 3)

    # Deterministic "parameter" init (nn.Linear(hidden, hidden, bias=False) weight).
    W = jax.random.normal(k_w, (H, H), dtype=jnp.float32) * 0.1
    h_enc = jax.random.normal(k_enc, (B, S_enc, H), dtype=jnp.float32)
    h_t_dec = jax.random.normal(k_dec, (B, S_dec, H), dtype=jnp.float32)

    # Mask the last two encoder positions of batch element 1 (True = masked).
    mask = jnp.zeros((B, S_enc), dtype=bool).at[1, -2:].set(True)

    ref = attention_ref(W, h_enc, h_t_dec, mask)
    ref_nm = attention_ref(W, h_enc, h_t_dec, None)

    # Full-f32 path: numerics parity with the PyTorch float32 module.
    out = jax.block_until_ready(attention(W, h_enc, h_t_dec, mask, matmul_dtype=jnp.float32))
    assert out.shape == (B, S_dec, H)
    assert jnp.allclose(out, ref, atol=1e-4, rtol=1e-4), "masked f32 mismatch vs reference"

    out_nm = jax.block_until_ready(attention(W, h_enc, h_t_dec, None, matmul_dtype=jnp.float32))
    assert jnp.allclose(out_nm, ref_nm, atol=1e-4, rtol=1e-4), "unmasked f32 mismatch vs reference"

    # Auto path (bf16 MXU inputs on v6e/v7x, f32 elsewhere): looser tolerance.
    out_auto = jax.block_until_ready(attention(W, h_enc, h_t_dec, mask))
    assert out_auto.shape == (B, S_dec, H)
    assert jnp.allclose(out_auto, ref, atol=1e-1, rtol=1e-1), "auto-dtype mismatch vs reference"

    print("KERNEL_OK")
</pallas_src>

<mosaic_0001>
module attributes {stable_mosaic.version = 11 : i64} {
  func.func @_fused_attention_kernel(%arg0: i32, %arg1: i32, %arg2: memref<128x128xf32, #tpu.memory_space<vmem>>, %arg3: memref<2x8x128xf32, #tpu.memory_space<vmem>>, %arg4: memref<2x128x128xf32, #tpu.memory_space<vmem>>, %arg5: memref<2x1x128xf32, #tpu.memory_space<vmem>>, %arg6: memref<2x8x128xf32, #tpu.memory_space<vmem>>, %arg7: memref<2x8x128xf32, #tpu.memory_space<vmem>>, %arg8: memref<2x8x1xf32, #tpu.memory_space<vmem>>, %arg9: memref<2x8x1xf32, #tpu.memory_space<vmem>>, %arg10: memref<2x8x128xf32, #tpu.memory_space<vmem>>) attributes {dimension_semantics = [#tpu.dimension_semantics<parallel>, #tpu.dimension_semantics<arbitrary>], iteration_bounds = array<i64: 1, 1>, scalar_prefetch = 0 : i64, scratch_operands = 4 : i64, tpu.core_type = #tpu.core_type<tc>, window_params = [{pipeline_mode = #tpu.pipeline_mode<synchronous>, transform_indices = @transform_0, window_bounds = array<i64: 128, 128>}, {transform_indices = @transform_1, window_bounds = array<i64: 2, 8, 128>}, {transform_indices = @transform_2, window_bounds = array<i64: 2, 128, 128>}, {transform_indices = @transform_3, window_bounds = array<i64: 2, 1, 128>}, {transform_indices = @transform_4, window_bounds = array<i64: 2, 8, 128>}]} {
    %c0_i32 = arith.constant 0 : i32
    %0 = arith.cmpi eq, %arg1, %c0_i32 : i32
    %1 = arith.extui %0 : i1 to i32
    %c0_i32_0 = arith.constant 0 : i32
    %2 = arith.cmpi ne, %1, %c0_i32_0 : i32
    scf.if %2 {
      %c0_33 = arith.constant 0 : index
      %c0_34 = arith.constant 0 : index
      %c0_35 = arith.constant 0 : index
      %36 = vector.load %arg3[%c0_33, %c0_34, %c0_35] : memref<2x8x128xf32, #tpu.memory_space<vmem>>, vector<2x8x128xf32>
      %c0_36 = arith.constant 0 : index
      %c0_37 = arith.constant 0 : index
      %37 = vector.load %arg2[%c0_36, %c0_37] : memref<128x128xf32, #tpu.memory_space<vmem>>, vector<128x128xf32>
      %cst_38 = arith.constant dense<0.000000e+00> : vector<2x8x128xf32>
      %38 = tpu.matmul %36, %37, %cst_38 {dimension_numbers = #tpu.dot_dimension_numbers<[2], [1], [0, 1], [0], [0, 0, 0, 1, 1, 0], [], []>} : vector<2x8x128xf32>, vector<128x128xf32>, vector<2x8x128xf32> -> vector<2x8x128xf32>
      %c0_39 = arith.constant 0 : index
      %c0_40 = arith.constant 0 : index
      %c0_41 = arith.constant 0 : index
      %39 = vector.load %arg7[%c0_39, %c0_40, %c0_41] : memref<2x8x128xf32, #tpu.memory_space<vmem>>, vector<2x8x128xf32>
      tpu.vector_store %arg7[%c0_39, %c0_40, %c0_41], %38 {strides = array<i32>} : memref<2x8x128xf32, #tpu.memory_space<vmem>>, vector<2x8x128xf32>,
      %cst_42 = arith.constant 0xFF800000 : f32
      %40 = vector.broadcast %cst_42 : f32 to vector<2x8x1xf32>
      %c0_43 = arith.constant 0 : index
      %c0_44 = arith.constant 0 : index
      %c0_45 = arith.constant 0 : index
      %41 = vector.load %arg8[%c0_43, %c0_44, %c0_45] : memref<2x8x1xf32, #tpu.memory_space<vmem>>, vector<2x8x1xf32>
      tpu.vector_store %arg8[%c0_43, %c0_44, %c0_45], %40 {strides = array<i32>} : memref<2x8x1xf32, #tpu.memory_space<vmem>>, vector<2x8x1xf32>,
      %cst_46 = arith.constant 0.000000e+00 : f32
      %42 = vector.broadcast %cst_46 : f32 to vector<2x8x1xf32>
      %c0_47 = arith.constant 0 : index
      %c0_48 = arith.constant 0 : index
      %c0_49 = arith.constant 0 : index
      %43 = vector.load %arg9[%c0_47, %c0_48, %c0_49] : memref<2x8x1xf32, #tpu.memory_space<vmem>>, vector<2x8x1xf32>
      tpu.vector_store %arg9[%c0_47, %c0_48, %c0_49], %42 {strides = array<i32>} : memref<2x8x1xf32, #tpu.memory_space<vmem>>, vector<2x8x1xf32>,
      %cst_50 = arith.constant 0.000000e+00 : f32
      %44 = vector.broadcast %cst_50 : f32 to vector<2x8x128xf32>
      %c0_51 = arith.constant 0 : index
      %c0_52 = arith.constant 0 : index
      %c0_53 = arith.constant 0 : index
      %45 = vector.load %arg10[%c0_51, %c0_52, %c0_53] : memref<2x8x128xf32, #tpu.memory_space<vmem>>, vector<2x8x128xf32>
      tpu.vector_store %arg10[%c0_51, %c0_52, %c0_53], %44 {strides = array<i32>} : memref<2x8x128xf32, #tpu.memory_space<vmem>>, vector<2x8x128xf32>,
    } else {
    }
    %c0 = arith.constant 0 : index
    %c0_1 = arith.constant 0 : index
    %c0_2 = arith.constant 0 : index
    %3 = vector.load %arg4[%c0, %c0_1, %c0_2] : memref<2x128x128xf32, #tpu.memory_space<vmem>>, vector<2x128x128xf32>
    %c0_3 = arith.constant 0 : index
    %c0_4 = arith.constant 0 : index
    %c0_5 = arith.constant 0 : index
    %4 = vector.load %arg7[%c0_3, %c0_4, %c0_5] : memref<2x8x128xf32, #tpu.memory_space<vmem>>, vector<2x8x128xf32>
    %cst = arith.constant dense<0.000000e+00> : vector<2x8x128xf32>
    %5 = tpu.matmul %4, %3, %cst {dimension_numbers = #tpu.dot_dimension_numbers<[2], [2], [1], [1], [0, 0, 0, 1, 1, 1], [0], [0]>} : vector<2x8x128xf32>, vector<2x128x128xf32>, vector<2x8x128xf32> -> vector<2x8x128xf32>
    %c0_6 = arith.constant 0 : index
    %c0_7 = arith.constant 0 : index
    %c0_8 = arith.constant 0 : index
    %6 = vector.load %arg5[%c0_6, %c0_7, %c0_8] : memref<2x1x128xf32, #tpu.memory_space<vmem>>, vector<2x1x128xf32>
    %7 = vector.broadcast %6 : vector<2x1x128xf32> to vector<2x8x128xf32>
    %8 = arith.addf %5, %7 : vector<2x8x128xf32>
    %c0_9 = arith.constant 0 : index
    %c0_10 = arith.constant 0 : index
    %c0_11 = arith.constant 0 : index
    %9 = vector.load %arg8[%c0_9, %c0_10, %c0_11] : memref<2x8x1xf32, #tpu.memory_space<vmem>>, vector<2x8x1xf32>
    %cst_12 = arith.constant dense<0xFF800000> : vector<2x8xf32>
    %10 = vector.multi_reduction <maximumf>, %8, %cst_12 [2] : vector<2x8x128xf32> to vector<2x8xf32>
    %11 = vector.shape_cast %10 : vector<2x8xf32> to vector<2x8x1xf32>
    %12 = arith.maximumf %9, %11 : vector<2x8x1xf32>
    %cst_13 = arith.constant -1.000000e+30 : f32
    %13 = vector.broadcast %cst_13 : f32 to vector<2x8x1xf32>
    %14 = arith.maximumf %12, %13 : vector<2x8x1xf32>
    %15 = arith.subf %9, %14 : vector<2x8x1xf32>
    %16 = math.exp %15 : vector<2x8x1xf32>
    %17 = vector.broadcast %14 : vector<2x8x1xf32> to vector<2x8x128xf32>
    %18 = arith.subf %8, %17 : vector<2x8x128xf32>
    %19 = math.exp %18 : vector<2x8x128xf32>
    %c0_14 = arith.constant 0 : index
    %c0_15 = arith.constant 0 : index
    %c0_16 = arith.constant 0 : index
    %20 = vector.load %arg9[%c0_14, %c0_15, %c0_16] : memref<2x8x1xf32, #tpu.memory_space<vmem>>, vector<2x8x1xf32>
    %21 = arith.mulf %16, %20 : vector<2x8x1xf32>
    %cst_17 = arith.constant dense<0.000000e+00> : vector<2x8xf32>
    %22 = vector.multi_reduction <add>, %19, %cst_17 [2] : vector<2x8x128xf32> to vector<2x8xf32>
    %23 = vector.shape_cast %22 : vector<2x8xf32> to vector<2x8x1xf32>
    %24 = arith.addf %21, %23 : vector<2x8x1xf32>
    %c0_18 = arith.constant 0 : index
    %c0_19 = arith.constant 0 : index
    %c0_20 = arith.constant 0 : index
    %25 = vector.load %arg9[%c0_18, %c0_19, %c0_20] : memref<2x8x1xf32, #tpu.memory_space<vmem>>, vector<2x8x1xf32>
    tpu.vector_store %arg9[%c0_18, %c0_19, %c0_20], %24 {strides = array<i32>} : memref<2x8x1xf32, #tpu.memory_space<vmem>>, vector<2x8x1xf32>,
    %c0_21 = arith.constant 0 : index
    %c0_22 = arith.constant 0 : index
    %c0_23 = arith.constant 0 : index
    %26 = vector.load %arg10[%c0_21, %c0_22, %c0_23] : memref<2x8x128xf32, #tpu.memory_space<vmem>>, vector<2x8x128xf32>
    %27 = vector.broadcast %16 : vector<2x8x1xf32> to vector<2x8x128xf32>
    %28 = arith.mulf %27, %26 : vector<2x8x128xf32>
    %cst_24 = arith.constant dense<0.000000e+00> : vector<2x8x128xf32>
    %29 = tpu.matmul %19, %3, %cst_24 {dimension_numbers = #tpu.dot_dimension_numbers<[2], [1], [1], [2], [0, 0, 0, 1, 1, 2], [0], [0]>} : vector<2x8x128xf32>, vector<2x128x128xf32>, vector<2x8x128xf32> -> vector<2x8x128xf32>
    %30 = arith.addf %28, %29 : vector<2x8x128xf32>
    %c0_25 = arith.constant 0 : index
    %c0_26 = arith.constant 0 : index
    %c0_27 = arith.constant 0 : index
    %31 = vector.load %arg10[%c0_25, %c0_26, %c0_27] : memref<2x8x128xf32, #tpu.memory_space<vmem>>, vector<2x8x128xf32>
    tpu.vector_store %arg10[%c0_25, %c0_26, %c0_27], %30 {strides = array<i32>} : memref<2x8x128xf32, #tpu.memory_space<vmem>>, vector<2x8x128xf32>,
    %c0_28 = arith.constant 0 : index
    %c0_29 = arith.constant 0 : index
    %c0_30 = arith.constant 0 : index
    %32 = vector.load %arg8[%c0_28, %c0_29, %c0_30] : memref<2x8x1xf32, #tpu.memory_space<vmem>>, vector<2x8x1xf32>
    tpu.vector_store %arg8[%c0_28, %c0_29, %c0_30], %14 {strides = array<i32>} : memref<2x8x1xf32, #tpu.memory_space<vmem>>, vector<2x8x1xf32>,
    %c0_i32_31 = arith.constant 0 : i32
    %33 = arith.cmpi eq, %arg1, %c0_i32_31 : i32
    %34 = arith.extui %33 : i1 to i32
    %c0_i32_32 = arith.constant 0 : i32
    %35 = arith.cmpi ne, %34, %c0_i32_32 : i32
    scf.if %35 {
      %c0_33 = arith.constant 0 : index
      %c0_34 = arith.constant 0 : index
      %c0_35 = arith.constant 0 : index
      %36 = vector.load %arg9[%c0_33, %c0_34, %c0_35] : memref<2x8x1xf32, #tpu.memory_space<vmem>>, vector<2x8x1xf32>
      %37 = tpu.reciprocal %36 {approx = true} : vector<2x8x1xf32> -> vector<2x8x1xf32>
      %38 = arith.mulf %36, %37 : vector<2x8x1xf32>
      %cst_36 = arith.constant 2.000000e+00 : f32
      %39 = vector.broadcast %cst_36 : f32 to vector<2x8x1xf32>
      %40 = arith.subf %39, %38 : vector<2x8x1xf32>
      %41 = arith.mulf %37, %40 : vector<2x8x1xf32>
      %c0_37 = arith.constant 0 : index
      %c0_38 = arith.constant 0 : index
      %c0_39 = arith.constant 0 : index
      %42 = vector.load %arg10[%c0_37, %c0_38, %c0_39] : memref<2x8x128xf32, #tpu.memory_space<vmem>>, vector<2x8x128xf32>
      %43 = vector.broadcast %41 : vector<2x8x1xf32> to vector<2x8x128xf32>
      %44 = arith.mulf %42, %43 : vector<2x8x128xf32>
      %c0_40 = arith.constant 0 : index
      %c0_41 = arith.constant 0 : index
      %c0_42 = arith.constant 0 : index
      %45 = vector.load %arg6[%c0_40, %c0_41, %c0_42] : memref<2x8x128xf32, #tpu.memory_space<vmem>>, vector<2x8x128xf32>
      tpu.vector_store %arg6[%c0_40, %c0_41, %c0_42], %44 {strides = array<i32>} : memref<2x8x128xf32, #tpu.memory_space<vmem>>, vector<2x8x128xf32>,
    } else {
    }
    return
  }
  func.func @transform_0(%arg0: i32, %arg1: i32) -> (i32, i32) {
    %c0_i32 = arith.constant 0 : i32
    %c0_i32_0 = arith.constant 0 : i32
    %c0_i32_1 = arith.constant 0 : i32
    return %c0_i32, %c0_i32_0 : i32, i32
  }
  func.func @transform_1(%arg0: i32, %arg1: i32) -> (i32, i32, i32) {
    %c0_i32 = arith.constant 0 : i32
    %c0_i32_0 = arith.constant 0 : i32
    %c0_i32_1 = arith.constant 0 : i32
    return %arg0, %c0_i32, %c0_i32_0 : i32, i32, i32
  }
  func.func @transform_2(%arg0: i32, %arg1: i32) -> (i32, i32, i32) {
    %c0_i32 = arith.constant 0 : i32
    %c0_i32_0 = arith.constant 0 : i32
    return %arg0, %arg1, %c0_i32 : i32, i32, i32
  }
  func.func @transform_3(%arg0: i32, %arg1: i32) -> (i32, i32, i32) {
    %c0_i32 = arith.constant 0 : i32
    %c0_i32_0 = arith.constant 0 : i32
    return %arg0, %c0_i32, %arg1 : i32, i32, i32
  }
  func.func @transform_4(%arg0: i32, %arg1: i32) -> (i32, i32, i32) {
    %c0_i32 = arith.constant 0 : i32
    %c0_i32_0 = arith.constant 0 : i32
    %c0_i32_1 = arith.constant 0 : i32
    return %arg0, %c0_i32, %c0_i32_0 : i32, i32, i32
  }
}

</mosaic_0001>

<bundles_post_ra>
// kernel: tpu_custom_call.1
= control target key start
LH: loop header
LB: loop body
LE: loop exit
PB: predicated region body
PF: predicated region fallthrough
CT: control target
= control target key end

     0   :  { %9 = vsyncpa [#allocation7], 0  ;;  %s1338_s0 = inlined_call_operand.hbm [shape: f32[128,128], index: 0, kind: input, shape index: {}]   ;;  %s1339_s1 = inlined_call_operand.hbm [shape: f32[2,8,128], index: 1, kind: input, shape index: {}]   ;;  %s1340_s2 = inlined_call_operand.hbm [shape: f32[2,128,128], index: 2, kind: input, shape index: {}]   ;;  %s1341_s3 = inlined_call_operand.vmem [shape: f32[2,1,128], index: 3, kind: input, shape index: {}]   ;;  %s1342_s4 = inlined_call_operand.hbm [shape: f32[2,8,128], index: 4, kind: output, shape index: {}]  }
   0x1   :  { %10 = vsyncpa [#allocation10], 0 }
   0x2   :  { %11 = vsyncpa [#allocation8], 0  ;;  %s1115_s15 = smov [#allocation9]   ;;  %s1116_s17 = smov [#allocation6]  }
   0x3   :  { %s29_s16 = sshll.u32 %s1115_s15, 4  ;;  %s17_s18 = sshll.u32 %s1116_s17, 4  ;;  %s30_s16 = int_to_ptr.vmem [resolvable:$true] %s29_s16  ;;  %s1151_s18 = int_to_ptr.vmem [resolvable:$true] %s17_s18 }
   0x4   :  { %s1021_s21 = scalar_lea.hbm %s1339_s1, 256 }
   0x5   :  { %p1022_p0 = scmp.ne.s32.totalorder %s1339_s1, %s1021_s21  ;;  %p1025_p1 = scmp.lt.u32.totalorder %s1021_s21, %s1339_s1 }
   0x7   :  { %p1027_p2 = pnand %p1025_p1, %p1022_p0 }
   0x9   :  { %1030 = shalt.err (!%p1027_p2)
}
   0xa   :  { %s1031_s26 = scalar_lea.vmem %s30_s16, 256  ;;  %p1036_p4 = scmp.lt.s32.totalorder %s30_s16, %s30_s16 }
   0xb   :  { %p1032_p3 = scmp.ne.s32.totalorder %s30_s16, %s1031_s26  ;;  %p1037_p5 = scmp.lt.s32.totalorder %s1031_s26, %s1031_s26 }
   0xd   :  { %p1038_p6 = por %p1037_p5, %p1036_p4 }
   0xf   :  { %p1039_p7 = pnand %p1038_p6, %p1032_p3 }
  0x11   :  { %1042 = shalt.err (!%p1039_p7)
}
  0x12   :  { %s1117_s27 = smov 128   ;;  %s1118_s28 = smov 8  }
  0x13   :  { %35 = dma.hbm_to_vmem [thread:$0]  %s1339_s1, 256, %s30_s16, [#allocation10], %s1117_s27, %s1117_s27, %s1118_s28  }
  0x14   :  { %s1043_s7 = scalar_lea.hbm %s1338_s0, 2048 }
  0x15   :  { %p1044_p8 = scmp.ne.s32.totalorder %s1338_s0, %s1043_s7  ;;  %p1047_p9 = scmp.lt.u32.totalorder %s1043_s7, %s1338_s0 }
  0x17   :  { %p1049_p10 = pnand %p1047_p9, %p1044_p8 }
  0x19   :  { %1052 = shalt.err (!%p1049_p10)
}
  0x1a   :  { %s1053_s12 = scalar_lea.vmem %s1151_s18, 2048  ;;  %p1058_p12 = scmp.lt.s32.totalorder %s1151_s18, %s1151_s18 }
  0x1b   :  { %p1054_p11 = scmp.ne.s32.totalorder %s1151_s18, %s1053_s12  ;;  %p1059_p13 = scmp.lt.s32.totalorder %s1053_s12, %s1053_s12 }
  0x1d   :  { %p1060_p0 = por %p1059_p13, %p1058_p12 }
  0x1f   :  { %p1061_p1 = pnand %p1060_p0, %p1054_p11 }
  0x21   :  { %1064 = shalt.err (!%p1061_p1)
}
  0x22   :  { %23 = dma.hbm_to_vmem [thread:$0]  %s1338_s0, 2048, %s1151_s18, [#allocation7], %s1117_s27, %s1117_s27, %s1118_s28  }
  0x23   :  { %s1119_s14 = smov [#allocation11]   ;;  %s1065_s19 = scalar_lea.hbm %s1340_s2, 4096 }
  0x24   :  { %s41_s15 = sshll.u32 %s1119_s14, 4  ;;  %p1066_p2 = scmp.ne.s32.totalorder %s1340_s2, %s1065_s19  ;;  %s42_s15 = int_to_ptr.vmem [resolvable:$true] %s41_s15 }
  0x25   :  { %p1069_p3 = scmp.lt.u32.totalorder %s1065_s19, %s1340_s2 }
  0x27   :  { %p1071_p4 = pnand %p1069_p3, %p1066_p2 }
  0x29   :  { %1074 = shalt.err (!%p1071_p4)
}
  0x2a   :  { %s1075_s24 = scalar_lea.vmem %s42_s15, 4096  ;;  %p1080_p6 = scmp.lt.s32.totalorder %s42_s15, %s42_s15 }
  0x2b   :  { %p1076_p5 = scmp.ne.s32.totalorder %s42_s15, %s1075_s24  ;;  %p1081_p7 = scmp.lt.s32.totalorder %s1075_s24, %s1075_s24 }
  0x2d   :  { %p1082_p8 = por %p1081_p7, %p1080_p6 }
  0x2f   :  { %p1083_p9 = pnand %p1082_p8, %p1076_p5 }
  0x31   :  { %1086 = shalt.err (!%p1083_p9)
}
  0x32   :  { %47 = dma.hbm_to_vmem [thread:$0]  %s1340_s2, 4096, %s42_s15, [#allocation10], %s1117_s27, %s1117_s27, %s1118_s28  }
  0x33   :  { %1109 = dma.done.wait [#allocation7], 2048  }
  0x34   :  { %1110 = vsyncadd [#allocation7], 4294965248 }
  0x35   :  { %1111 = dma.done.wait [#allocation10], 4352  }
  0x36   :  { %1112 = vsyncadd [#allocation10], 4294962944  ;;  %v1120_v0 = vmov 0.0|0.0   ;;  %v65_v1 = vld [vmem:[#allocation6] sm:$0xff]  ;;  %v66_v2 = vld [vmem:[#allocation6 + $0x8] sm:$0xff]  ;;  %vm1121_vm0 = vmmov 0  }
  0x37   :  { %900 = vmatprep.subr.bf16.mxu1 %v1120_v0  ;;  %v67_v3 = vld [vmem:[#allocation6 + $0x10] sm:$0xff]  ;;  %v868_v4 = vpack.c.bf16 %v66_v2, %v65_v1  ;;  %v68_v5 = vld [vmem:[#allocation6 + $0x18] sm:$0xff]  ;;  %v63_v7 = vld [vmem:[#allocation9] sm:$0xff]  ;;  %vm158_vm1 = vcmask 7168  }
  0x38   :  { %v872_v6 = vpack.c.bf16 %v68_v5, %v67_v3  ;;  %v69_v8 = vld [vmem:[#allocation6 + $0x20] sm:$0xff]  ;;  %v70_v9 = vld [vmem:[#allocation6 + $0x28] sm:$0xff]  ;;  %725 = vmatprep.mubr.f32.mxu0 %v63_v7  ;;  %v165_v10 = vld [vmem:[#allocation11] sm:$0xff] }
  0x39   :  { %869 = vmatprep.subr.bf16.mxu0 %v868_v4  ;;  %v166_v11 = vld [vmem:[#allocation11 + $0x8] sm:$0xff]  ;;  %v876_v13 = vpack.c.bf16 %v70_v9, %v69_v8  ;;  %v167_v14 = vld [vmem:[#allocation11 + $0x10] sm:$0xff]  ;;  %v168_v15 = vld [vmem:[#allocation11 + $0x18] sm:$0xff] }
  0x3a   :  { %871 = vmatpush3.bf16.xpose.msra.mxu0 %v868_v4  ;;  %v1204_v12 = vpack.c.bf16 %v166_v11, %v165_v10  ;;  %v71_v16 = vld [vmem:[#allocation6 + $0x30] sm:$0xff]  ;;  %v72_v17 = vld [vmem:[#allocation6 + $0x38] sm:$0xff]  ;;  %v1208_v18 = vpack.c.bf16 %v168_v15, %v167_v14  ;;  %v73_v22 = vld [vmem:[#allocation6 + $0x40] sm:$0xff] }
  0x3b   :  { %873 = vmatprep.subr.bf16.mxu0 %v872_v6  ;;  %v880_v19 = vpack.c.bf16 %v72_v17, %v71_v16  ;;  %v169_v20 = vld [vmem:[#allocation11 + $0x20] sm:$0xff]  ;;  %v170_v21 = vld [vmem:[#allocation11 + $0x28] sm:$0xff]  ;;  %v74_v23 = vld [vmem:[#allocation6 + $0x48] sm:$0xff] }
  0x3c   :  { %902 = vmatpush3.bf16.xpose.msra.mxu1 %v1204_v12  ;;  %v1212_v24 = vpack.c.bf16 %v170_v21, %v169_v20  ;;  %v884_v25 = vpack.c.bf16 %v74_v23, %v73_v22  ;;  %v171_v26 = vld [vmem:[#allocation11 + $0x30] sm:$0xff]  ;;  %v172_v27 = vld [vmem:[#allocation11 + $0x38] sm:$0xff]  ;;  %v75_v28 = vld [vmem:[#allocation6 + $0x50] sm:$0xff] }
  0x3d   :  { %903 = vmatprep.subr.bf16.mxu1 %v1120_v0  ;;  %v76_v29 = vld [vmem:[#allocation6 + $0x58] sm:$0xff]  ;;  %v1216_v30 = vpack.c.bf16 %v172_v27, %v171_v26  ;;  %v173_v32 = vld [vmem:[#allocation11 + $0x40] sm:$0xff]  ;;  %v77_v34 = vld [vmem:[#allocation6 + $0x60] sm:$0xff] }
  0x3e   :  { %v888_v31 = vpack.c.bf16 %v76_v29, %v75_v28  ;;  %v174_v33 = vld [vmem:[#allocation11 + $0x48] sm:$0xff]  ;;  %v78_v35 = vld [vmem:[#allocation6 + $0x68] sm:$0xff]  ;;  %v175_v38 = vld [vmem:[#allocation11 + $0x50] sm:$0xff] }
  0x3f   :  { %v1220_v36 = vpack.c.bf16 %v174_v33, %v173_v32  ;;  %v892_v37 = vpack.c.bf16 %v78_v35, %v77_v34  ;;  %v176_v39 = vld [vmem:[#allocation11 + $0x58] sm:$0xff]  ;;  %v79_v40 = vld [vmem:[#allocation6 + $0x70] sm:$0xff]  ;;  %v80_v41 = vld [vmem:[#allocation6 + $0x78] sm:$0xff] }
  0x40   :  { %v1224_v42 = vpack.c.bf16 %v176_v39, %v175_v38  ;;  %v896_v43 = vpack.c.bf16 %v80_v41, %v79_v40  ;;  %v177_v44 = vld [vmem:[#allocation11 + $0x60] sm:$0xff]  ;;  %v178_v45 = vld [vmem:[#allocation11 + $0x68] sm:$0xff]  ;;  %v179_v47 = vld [vmem:[#allocation11 + $0x70] sm:$0xff] }
  0x41   :  { %v1228_v46 = vpack.c.bf16 %v178_v45, %v177_v44  ;;  %v180_v48 = vld [vmem:[#allocation11 + $0x78] sm:$0xff]  ;;  %v181_v49 = vld [vmem:[#allocation11 + $0x80] sm:$0xff]  ;;  %v182_v50 = vld [vmem:[#allocation11 + $0x88] sm:$0xff] }
  0x42   :  { %875 = vmatpush3.bf16.xpose.msra.mxu0 %v872_v6  ;;  %v1233_v51 = vpack.c.bf16 %v180_v48, %v179_v47  ;;  %v64_v52 = vld [vmem:[#allocation9 + $0x8] sm:$0xff]  ;;  %v1235_v53 = vpack.c.bf16 %v182_v50, %v181_v49  ;;  %v183_v54 = vld [vmem:[#allocation11 + $0x90] sm:$0xff]  ;;  %v185_v57 = vld [vmem:[#allocation11 + $0xa0] sm:$0xff] }
  0x43   :  { %877 = vmatprep.subr.bf16.mxu0 %v876_v13  ;;  %v184_v55 = vld [vmem:[#allocation11 + $0x98] sm:$0xff]  ;;  %v186_v58 = vld [vmem:[#allocation11 + $0xa8] sm:$0xff]  ;;  %v187_v60 = vld [vmem:[#allocation11 + $0xb0] sm:$0xff] }
  0x44   :  { %905 = vmatpush3.bf16.xpose.msra.mxu1 %v1208_v18  ;;  %v1241_v56 = vpack.c.bf16 %v184_v55, %v183_v54  ;;  %v1245_v59 = vpack.c.bf16 %v186_v58, %v185_v57  ;;  %v188_v61 = vld [vmem:[#allocation11 + $0xb8] sm:$0xff]  ;;  %v189_v63 = vld [vmem:[#allocation11 + $0xc0] sm:$0xff]  ;;  %v190_v1 = vld [vmem:[#allocation11 + $0xc8] sm:$0xff] }
  0x45   :  { %906 = vmatprep.subr.bf16.mxu1 %v1120_v0  ;;  %v1249_v62 = vpack.c.bf16 %v188_v61, %v187_v60  ;;  %v1253_v2 = vpack.c.bf16 %v190_v1, %v189_v63  ;;  %v191_v3 = vld [vmem:[#allocation11 + $0xd0] sm:$0xff]  ;;  %v192_v4 = vld [vmem:[#allocation11 + $0xd8] sm:$0xff]  ;;  %v193_v6 = vld [vmem:[#allocation11 + $0xe0] sm:$0xff] }
  0x46   :  { %v1257_v5 = vpack.c.bf16 %v192_v4, %v191_v3  ;;  %v194_v7 = vld [vmem:[#allocation11 + $0xe8] sm:$0xff]  ;;  %v195_v9 = vld [vmem:[#allocation11 + $0xf0] sm:$0xff]  ;;  %v196_v10 = vld [vmem:[#allocation11 + $0xf8] sm:$0xff] }
  0x47   :  { %v1261_v8 = vpack.c.bf16 %v194_v7, %v193_v6  ;;  %v1265_v11 = vpack.c.bf16 %v196_v10, %v195_v9  ;;  %v605_v16 = vld [vmem:[%s1341_s3] ss:$0 sm:$0xff]  ;;  %v606_v22 = vld [vmem:[%s1341_s3 + $0x1] ss:$0 sm:$0xff]  ;;  %s1125_s3 = smov [#allocation12]  }
  0x48   :  { %s592_s30 = sshll.u32 %s1125_s3, 4  ;;  %s593_s30 = int_to_ptr.vmem [resolvable:$true] %s592_s30 }
  0x49   :  { %s1087_s5 = scalar_lea.vmem %s593_s30, 256  ;;  %p1092_p11 = scmp.lt.s32.totalorder %s593_s30, %s593_s30 }
  0x4a   :  { %879 = vmatpush3.bf16.xpose.msra.mxu0 %v876_v13  ;;  %v1122_v13 = vmov 0.0   ;;  %p1088_p10 = scmp.ne.s32.totalorder %s593_s30, %s1087_s5  ;;  %p1093_p12 = scmp.lt.s32.totalorder %s1087_s5, %s1087_s5 }
  0x4b   :  { %881 = vmatprep.subr.bf16.mxu0 %v880_v19  ;;  %760 = vmatprep.mubr.msk.f32.mxu1 %vm1121_vm0, %v1122_v13  ;;  %161 = vst.msk [vmem:[#allocation4] sm:$0xff] %vm158_vm1, %v1122_v13  ;;  %162 = vst.msk [vmem:[#allocation4 + $0x8] sm:$0xff] %vm158_vm1, %v1122_v13 }
  0x4c   :  { %908 = vmatpush3.bf16.xpose.msra.mxu1 %v1212_v24  ;;  %p1094_p13 = por %p1093_p12, %p1092_p11 }
  0x4d   :  { %909 = vmatprep.subr.bf16.mxu1 %v1120_v0 }
  0x4e   :  { %p1095_p0 = pnand %p1094_p13, %p1088_p10 }
  0x52   :  { %883 = vmatpush3.bf16.xpose.msra.mxu0 %v880_v19  ;;  %v385_v47 = vld [vmem:[#allocation4] sm:$0xff]  ;;  %v386_v50 = vld [vmem:[#allocation4 + $0x8] sm:$0xff] }
  0x53   :  { %885 = vmatprep.subr.bf16.mxu0 %v884_v25 }
  0x54   :  { %911 = vmatpush3.bf16.xpose.msra.mxu1 %v1216_v30 }
  0x55   :  { %912 = vmatprep.subr.bf16.mxu1 %v1120_v0 }
  0x5a   :  { %887 = vmatpush3.bf16.xpose.msra.mxu0 %v884_v25 }
  0x5b   :  { %889 = vmatprep.subr.bf16.mxu0 %v888_v31 }
  0x5c   :  { %914 = vmatpush3.bf16.xpose.msra.mxu1 %v1220_v36 }
  0x5d   :  { %915 = vmatprep.subr.bf16.mxu1 %v1120_v0 }
  0x62   :  { %891 = vmatpush3.bf16.xpose.msra.mxu0 %v888_v31 }
  0x63   :  { %893 = vmatprep.subr.bf16.mxu0 %v892_v37 }
  0x64   :  { %917 = vmatpush3.bf16.xpose.msra.mxu1 %v1224_v42 }
  0x65   :  { %918 = vmatprep.subr.bf16.mxu1 %v1120_v0 }
  0x6a   :  { %895 = vmatpush3.bf16.xpose.msra.mxu0 %v892_v37 }
  0x6b   :  { %897 = vmatprep.subr.bf16.mxu0 %v896_v43 }
  0x6c   :  { %920 = vmatpush3.bf16.xpose.msra.mxu1 %v1228_v46 }
  0x6d   :  { %921 = vmatprep.subr.bf16.mxu1 %v1120_v0 }
  0x72   :  { %899 = vmatpush3.bf16.xpose.msra.mxu0 %v896_v43 }
  0x73   :  { %924 = vmatprep.subr.bf16.mxu0 %v1120_v0 }
  0x74   :  { %923 = vmatpush3.bf16.xpose.msra.mxu1 %v1233_v51 }
  0x75   :  { %948 = vmatprep.subr.bf16.mxu1 %v1120_v0 }
  0x79   :  { %726 = vmatmul.mubr.f32.vlgmr.msra.gmra.mrb[0].mxu0 %v64_v52 }
  0x7a   :  { %926 = vmatpush3.bf16.xpose.msra.mxu0 %v1235_v53  ;;  %795 = vmatprep.mubr.msk.f32.mxu0 %vm1121_vm0, %v1122_v13 }
  0x7b   :  { %927 = vmatprep.subr.bf16.mxu0 %v1120_v0 }
  0x82   :  { %929 = vmatpush3.bf16.xpose.msra.mxu0 %v1241_v56 }
  0x83   :  { %930 = vmatprep.subr.bf16.mxu0 %v1120_v0 }
  0x8a   :  { %932 = vmatpush3.bf16.xpose.msra.mxu0 %v1245_v59 }
  0x8b   :  { %933 = vmatprep.subr.bf16.mxu0 %v1120_v0 }
  0x92   :  { %935 = vmatpush3.bf16.xpose.msra.mxu0 %v1249_v62 }
  0x93   :  { %936 = vmatprep.subr.bf16.mxu0 %v1120_v0 }
  0x9a   :  { %938 = vmatpush3.bf16.xpose.msra.mxu0 %v1253_v2 }
  0x9b   :  { %939 = vmatprep.subr.bf16.mxu0 %v1120_v0 }
  0xa2   :  { %941 = vmatpush3.bf16.xpose.msra.mxu0 %v1257_v5 }
  0xa3   :  { %942 = vmatprep.subr.bf16.mxu0 %v1120_v0 }
  0xaa   :  { %944 = vmatpush3.bf16.xpose.msra.mxu0 %v1261_v8 }
  0xab   :  { %945 = vmatprep.subr.bf16.mxu0 %v1120_v0 }
  0xb2   :  { %947 = vmatpush3.bf16.xpose.msra.mxu0 %v1265_v11 }
 0x14c   :  { %v727_v14 = vpop.f32.mrb[0].mxu0 }
 0x14d   :  { %v147_v15 = vpop.f32.mrb[1].mxu0  ;;  %796 = vmatmul.mubr.f32.vlgmr.msra.gmra.mrb[2].mxu0 %v727_v14 }
 0x14e   :  { %761 = vmatmul.mubr.f32.vlgmr.msra.gmra.mrb[0].mxu1 %v147_v15 }
 0x14f   :  { %950 = vmatpush3.bf16.msra.mxu1 %v1204_v12  ;;  %830 = vmatprep.mubr.msk.f32.mxu1 %vm1121_vm0, %v1122_v13  ;;  %v1123_v12 = vmov -inf  }
 0x150   :  { %951 = vmatprep.subr.bf16.mxu1 %v1120_v0  ;;  %159 = vst.msk [vmem:[#allocation3] sm:$0xff] %vm158_vm1, %v1123_v12  ;;  %160 = vst.msk [vmem:[#allocation3 + $0x8] sm:$0xff] %vm158_vm1, %v1123_v12 }
 0x153   :  { %953 = vmatpush3.bf16.msra.mxu1 %v1208_v18 }
 0x154   :  { %954 = vmatprep.subr.bf16.mxu1 %v1120_v0 }
 0x157   :  { %956 = vmatpush3.bf16.msra.mxu1 %v1212_v24  ;;  %v1124_v24 = vmov 0   ;;  %v353_v25 = vld [vmem:[#allocation3] sm:$0xff]  ;;  %v354_v28 = vld [vmem:[#allocation3 + $0x8] sm:$0xff] }
 0x158   :  { %957 = vmatprep.subr.bf16.mxu1 %v1120_v0  ;;  %1007 = vset.pattern.permute.xlu1 %v1124_v24 }
 0x159   :  { %1008 = vset.pattern.permute.xlu0 %v1124_v24 }
 0x15b   :  { %959 = vmatpush3.bf16.msra.mxu1 %v1216_v30 }
 0x15c   :  { %960 = vmatprep.subr.bf16.mxu1 %v1120_v0 }
 0x15f   :  { %962 = vmatpush3.bf16.msra.mxu1 %v1220_v36 }
 0x160   :  { %963 = vmatprep.subr.bf16.mxu1 %v1120_v0 }
 0x163   :  { %965 = vmatpush3.bf16.msra.mxu1 %v1224_v42 }
 0x164   :  { %966 = vmatprep.subr.bf16.mxu1 %v1120_v0 }
 0x167   :  { %968 = vmatpush3.bf16.msra.mxu1 %v1228_v46 }
 0x168   :  { %969 = vmatprep.subr.bf16.mxu1 %v1120_v0 }
 0x16b   :  { %971 = vmatpush3.bf16.msra.mxu1 %v1233_v51 }
 0x16c   :  { %972 = vmatprep.subr.bf16.mxu1 %v1120_v0 }
 0x220   :  { %v349_v17 = vpop.f32.mrb[2].mxu0 }
 0x221   :  { %v279_v18 = vpop.f32.mrb[0].mxu1  ;;  %v797_v19 = vpop.f32.mrb[3].mxu0  ;;  %v350_v23 = vadd.f32 %v606_v22, %v349_v17 }
 0x222   :  { %v280_v20 = vadd.f32 %v605_v16, %v279_v18  ;;  %v762_v21 = vpop.f32.mrb[1].mxu1 }
 0x224   :  { %355 = vmax.xlane.f32.xlu0 %v280_v20 }
 0x228   :  { %357 = vmax.xlane.f32.xlu0 %v350_v23 }
 0x2b1   :  { %v356_v26 = vpop.xlane.xlu0 %355 }
 0x2b2   :  { %v359_v27 = vmax.f32 %v353_v25, %v356_v26 }
 0x2b4   :  { %v361_v29 = vmax.f32 %v359_v27, -1e+30 }
 0x2b5   :  { %v358_v30 = vpop.xlane.xlu0 %357 }
 0x2b6   :  { %v363_v31 = vsub.f32 %v353_v25, %v361_v29  ;;  %556 = vst.msk [vmem:[#allocation3] sm:$0xff] %vm158_vm1, %v361_v29  ;;  %v360_v32 = vmax.f32 %v354_v28, %v358_v30  ;;  %371 = vperm.xlu1 %1007, %v361_v29  }
 0x2b8   :  { %v362_v33 = vmax.f32 %v360_v32, -1e+30  ;;  %v365_v44 = vmul.f32 1.442695, %v363_v31 }
 0x2ba   :  { %v364_v34 = vsub.f32 %v354_v28, %v362_v33  ;;  %557 = vst.msk [vmem:[#allocation3 + $0x8] sm:$0xff] %vm158_vm1, %v362_v33  ;;  %376 = vperm.xlu1 %1007, %v362_v33  }
 0x2bc   :  { %v367_v43 = vmul.f32 1.442695, %v364_v34 }
 0x335   :  { %v372_v35 = vpop.permute.xlu1 %371 }
 0x336   :  { %v379_v36 = vsub.f32 %v280_v20, %v372_v35 }
 0x338   :  { %v381_v37 = vmul.f32 1.442695, %v379_v36 }
 0x339   :  { %v377_v38 = vpop.permute.xlu1 %376 }
 0x33a   :  { %1009 = vpow2.f32 %v381_v37  ;;  %v380_v39 = vsub.f32 %v350_v23, %v377_v38 }
 0x33c   :  { %v383_v40 = vmul.f32 1.442695, %v380_v39 }
 0x33e   :  { %1011 = vpow2.f32 %v383_v40 }
 0x33f   :  { %1013 = vpow2.f32 %v367_v43 }
 0x340   :  { %1015 = vpow2.f32 %v365_v44 }
 0x344   :  { %v1010_v41 = vpop.eup %1009 }
 0x345   :  { %389 = vadd.xlane.f32.xlu0 %v1010_v41  ;;  %831 = vmatmul.mubr.f32.vlgmr.msra.gmra.mrb[2].mxu1 %v1010_v41 }
 0x346   :  { %974 = vmatpush3.bf16.msra.mxu1 %v1235_v53  ;;  %865 = vmatprep.mubr.msk.f32.mxu1 %vm1121_vm0, %v1122_v13 }
 0x347   :  { %975 = vmatprep.subr.bf16.mxu1 %v1120_v0 }
 0x348   :  { %v1012_v42 = vpop.eup %1011 }
 0x349   :  { %391 = vadd.xlane.f32.xlu1 %v1012_v42  ;;  %v1014_v45 = vpop.eup %1013 }
 0x34a   :  { %977 = vmatpush3.bf16.msra.mxu1 %v1241_v56  ;;  %v1016_v46 = vpop.eup %1015  ;;  %v388_v52 = vmul.f32 %v1014_v45, %v386_v50 }
 0x34b   :  { %978 = vmatprep.subr.bf16.mxu1 %v1120_v0  ;;  %v387_v48 = vmul.f32 %v1016_v46, %v385_v47 }
 0x34e   :  { %980 = vmatpush3.bf16.msra.mxu1 %v1245_v59 }
 0x34f   :  { %981 = vmatprep.subr.bf16.mxu1 %v1120_v0 }
 0x352   :  { %983 = vmatpush3.bf16.msra.mxu1 %v1249_v62 }
 0x353   :  { %984 = vmatprep.subr.bf16.mxu1 %v1120_v0 }
 0x356   :  { %986 = vmatpush3.bf16.msra.mxu1 %v1253_v2 }
 0x357   :  { %987 = vmatprep.subr.bf16.mxu1 %v1120_v0 }
 0x35a   :  { %989 = vmatpush3.bf16.msra.mxu1 %v1257_v5  ;;  %407 = vperm.xlu1 %1007, %v1014_v45  }
 0x35b   :  { %402 = vperm.xlu0 %1008, %v1016_v46   ;;  %990 = vmatprep.subr.bf16.mxu1 %v1120_v0 }
 0x35e   :  { %992 = vmatpush3.bf16.msra.mxu1 %v1261_v8 }
 0x35f   :  { %993 = vmatprep.subr.bf16.mxu1 %v1120_v0 }
 0x362   :  { %995 = vmatpush3.bf16.msra.mxu1 %v1265_v11 }
 0x365   :  { %866 = vmatmul.mubr.f32.vlgmr.msra.gmra.mrb[4].mxu1 %v1012_v42 }
 0x3d2   :  { %v390_v49 = vpop.xlane.xlu0 %389 }
 0x3d3   :  { %v393_v51 = vadd.f32 %v390_v49, %v387_v48 }
 0x3d5   :  { %396 = vst.msk [vmem:[#allocation4] sm:$0xff] %vm158_vm1, %v393_v51 }
 0x3d6   :  { %v392_v53 = vpop.xlane.xlu1 %391 }
 0x3d7   :  { %v394_v54 = vadd.f32 %v392_v53, %v388_v52 }
 0x3d9   :  { %397 = vst.msk [vmem:[#allocation4 + $0x8] sm:$0xff] %vm158_vm1, %v394_v54 }
 0x3da   :  { %v403_v5 = vpop.permute.xlu0 %402  ;;  %v408_v7 = vpop.permute.xlu1 %407 }
 0x3db   :  { %v410_v6 = vmul.f32 0.0, %v403_v5  ;;  %v411_v10 = vmul.f32 0.0, %v408_v7 }
 0x3dc   :  { %v561_v55 = vld [vmem:[#allocation4] sm:$0xff] }
 0x3dd   :  { %1017 = vrcp.f32 %v561_v55 }
 0x3e0   :  { %v562_v56 = vld [vmem:[#allocation4 + $0x8] sm:$0xff] }
 0x3e1   :  { %1019 = vrcp.f32 %v562_v56 }
 0x3e7   :  { %v1018_v0 = vpop.eup %1017 }
 0x3e8   :  { %v565_v57 = vmul.f32 %v1018_v0, %v561_v55 }
 0x3ea   :  { %v567_v58 = vsub.f32 2.0, %v565_v57 }
 0x3eb   :  { %v1020_v59 = vpop.eup %1019 }
 0x3ec   :  { %v569_v60 = vmul.f32 %v1018_v0, %v567_v58  ;;  %v566_v61 = vmul.f32 %v1020_v59, %v562_v56 }
 0x3ee   :  { %575 = vperm.xlu0 %1008, %v569_v60   ;;  %v568_v62 = vsub.f32 2.0, %v566_v61 }
 0x3f0   :  { %v570_v63 = vmul.f32 %v1020_v59, %v568_v62 }
 0x3f2   :  { %580 = vperm.xlu0 %1008, %v570_v63  }
 0x418   :  { %v478_v1 = vpop.f32.mrb[2].mxu1 }
 0x419   :  { %v832_v2 = vpop.f32.mrb[3].mxu1  ;;  %v552_v8 = vadd.f32 %v478_v1, %v410_v6 }
 0x438   :  { %v548_v3 = vpop.f32.mrb[4].mxu1 }
 0x439   :  { %v867_v4 = vpop.f32.mrb[5].mxu1  ;;  %v553_v13 = vadd.f32 %v548_v3, %v411_v10 }
 0x46d   :  { %v576_v9 = vpop.permute.xlu0 %575 }
 0x46e   :  { %v583_v11 = vmul.f32 %v576_v9, %v552_v8 }
 0x470   :  { %585 = vst [vmem:[#allocation12] sm:$0xff] %v583_v11 }
 0x471   :  { %v581_v14 = vpop.permute.xlu0 %580 }
 0x472   :  { %v584_v15 = vmul.f32 %v581_v14, %v553_v13 }
 0x474   :  { %586 = vst [vmem:[#allocation12 + $0x8] sm:$0xff] %v584_v15 }
 0x475   :  { %1098 = shalt.err (!%p1095_p0)
}
 0x476   :  { %s1099_s8 = scalar_lea.hbm %s1342_s4, 256 }
 0x477   :  { %p1100_p1 = scmp.ne.s32.totalorder %s1342_s4, %s1099_s8  ;;  %p1103_p2 = scmp.lt.u32.totalorder %s1099_s8, %s1342_s4 }
 0x479   :  { %p1105_p3 = pnand %p1103_p2, %p1100_p1 }
 0x47b   :  { %1108 = shalt.err (!%p1105_p3)
}
 0x47c   :  { %598 = dma.vmem_to_hbm [thread:$0]  %s593_s30, 256, %s1342_s4, [#allocation8], %s1117_s27, %s1117_s27, %s1118_s28  }
 0x47d   :  { %1113 = dma.done.wait [#allocation8], 256  }
 0x47e   :  { %1114 = vsyncadd [#allocation8], 4294967040 }
 0x47f   :  { %602 = vsyncpa [#allocation7], 1 }
 0x480   :  { %603 = vsyncpa [#allocation10], 1 }
 0x481   :  { %604 = vsyncpa [#allocation8], 1 }

</bundles_post_ra>
